<compile_context>
chip_gen: v7x
topology: tpu7x:2x2x1
jax: 0.10.0
libtpu: 0.0.40
codegen_flags: <defaults>
</compile_context>

<pallas_src>
import jax
import jax.numpy as jnp
import numpy as np
from jax.experimental import pallas as pl
from jax.experimental.pallas import tpu as pltpu


def glcm_kernel(x_ref, phi_ref, mask_ref, w_ref, bias_ref, o_ref):
    # x_ref:    (TB, m)       batch block of flattened images (batch on sublanes)
    # phi_ref:  (2, N, 1)     [phi_a; phi_b] thresholds (resident)
    # mask_ref: (1, m)        1.0 everywhere, 0.0 on the last lane (resident)
    # w_ref:    (N*N, HP)     final linear weight, lane-padded to HP=128 (resident)
    # bias_ref: (1, HP)       final linear bias, lane-padded (resident)
    # o_ref:    (TB, HP)      lane-dense output block
    a = x_ref[...]                                   # (TB, m) f32
    tb, m = a.shape

    # b = a @ D^T with D = I + superdiag(-1)  <=>  b[:, i] = a[:, i] - a[:, i+1],
    # b[:, m-1] = a[:, m-1].  roll(shift=m-1) makes lane i pick up a[:, (i+1) % m];
    # the resident 0/1 mask zeroes the wrap-around lane.  No dense (m, m) operand.
    a_next = pltpu.roll(a, shift=m - 1, axis=1) * mask_ref[...]
    b = a - a_next                                   # (TB, m)

    # S-thresholding: (TB, 1, m) - (1, N, 1) -> (TB, N, m), clipped to [0, 1].
    phi = phi_ref[...]                               # (2, N, 1)
    sa = jnp.clip(a[:, None, :] - phi[0][None, :, :], 0.0, 1.0)
    sb = jnp.clip(b[:, None, :] - phi[1][None, :, :], 0.0, 1.0)

    # G[t, i, j] = sum_m sa[t, i, m] * sb[t, j, m]   (one batched MXU matmul)
    g = jax.lax.dot_general(
        sa, sb, (((2,), (2,)), ((0,), (0,))),
        preferred_element_type=jnp.float32)          # (TB, N, N)
    n = g.shape[1]

    # out = relu(vec(G) @ W + bias) as a single lane-dense (TB, N*N) x (N*N, HP) matmul.
    g_flat = g.reshape(tb, n * n)                    # small in-VMEM relayout
    out = jnp.dot(g_flat, w_ref[...], preferred_element_type=jnp.float32)
    o_ref[...] = jnp.maximum(out + bias_ref[...], 0.0).astype(o_ref.dtype)


def glcm_forward(x, phi_a, phi_b, weight, bias, *, block_b=None):
    """x: (B, C, M, M) float32 -> (B, H) float32 (same math as the torch module)."""
    B = x.shape[0]
    m = int(np.prod(x.shape[1:]))
    N = phi_a.shape[0]
    H = bias.shape[0]
    assert weight.shape == (N * N, H)

    h_pad = max(128, ((H + 127) // 128) * 128)       # lane-dense output width

    # --- batch-tile selection (VMEM-budgeted, multiple of 8, keeps >=2 blocks) ---
    try:
        vmem_bytes = int(pltpu.get_tpu_info().vmem_capacity_bytes)
    except Exception:
        vmem_bytes = 64 << 20                        # conservative (v7x per-TC)
    # f32 bytes per batch row: sa+sb temps, G + flattened G, double-buffered x/out.
    per_row = 4 * (2 * N * m + 2 * N * N + 2 * m + 2 * h_pad)
    cap = max(8, min(256, (vmem_bytes // 2 // per_row) // 8 * 8))
    if block_b is not None:
        tb = max(8, (min(block_b, cap) + 7) // 8 * 8)
    else:
        two_blocks = (((B + 1) // 2) + 7) // 8 * 8   # >=2 grid blocks when batch allows
        tb = min(cap, max(8, two_blocks))
    n_blocks = pl.cdiv(B, tb)
    b_pad = n_blocks * tb

    # Resident bytes: padded weight + phi + bias + mask (generous lane padding).
    resident_bytes = 4 * (N * N * h_pad + 2 * N * 128 + h_pad + max(m, 128))
    needed = per_row * tb + resident_bytes
    vmem_limit = int(min(vmem_bytes * 9 // 10, max(32 << 20, needed * 2)))

    x_flat = x.reshape(B, m).astype(jnp.float32)
    if b_pad != B:                                   # pad batch to a multiple of the tile
        x_flat = jnp.pad(x_flat, ((0, b_pad - B), (0, 0)))
    phi = jnp.stack([phi_a.astype(jnp.float32),
                     phi_b.astype(jnp.float32)]).reshape(2, N, 1)
    mask = jnp.ones((1, m), jnp.float32).at[0, m - 1].set(0.0)
    w_pad = jnp.zeros((N * N, h_pad), jnp.float32).at[:, :H].set(weight.astype(jnp.float32))
    bias_pad = jnp.zeros((1, h_pad), jnp.float32).at[0, :H].set(bias.astype(jnp.float32))

    resident = pl.Buffered(1)                        # grid-invariant: single resident buffer

    out = pl.pallas_call(
        glcm_kernel,
        out_shape=jax.ShapeDtypeStruct((b_pad, h_pad), jnp.float32),
        grid_spec=pltpu.PrefetchScalarGridSpec(
            num_scalar_prefetch=0,
            grid=(n_blocks,),
            in_specs=[
                pl.BlockSpec((tb, m), lambda i: (i, 0)),                     # x block
                pl.BlockSpec((2, N, 1), lambda i: (0, 0, 0),
                             pipeline_mode=resident),                        # phi_a / phi_b
                pl.BlockSpec((1, m), lambda i: (0, 0),
                             pipeline_mode=resident),                        # wrap mask
                pl.BlockSpec((N * N, h_pad), lambda i: (0, 0),
                             pipeline_mode=resident),                        # weight (padded)
                pl.BlockSpec((1, h_pad), lambda i: (0, 0),
                             pipeline_mode=resident),                        # bias (padded)
            ],
            out_specs=pl.BlockSpec((tb, h_pad), lambda i: (i, 0)),
        ),
        compiler_params=pltpu.CompilerParams(
            dimension_semantics=("parallel",),
            vmem_limit_bytes=vmem_limit),
    )(x_flat, phi, mask, w_pad, bias_pad)
    return out[:B, :H]


def glcm_reference(x, phi_a, phi_b, weight, bias):
    """Pure-JAX reference mirroring the PyTorch forward."""
    B = x.shape[0]
    a = x.reshape(B, -1).astype(jnp.float32)
    m = a.shape[1]
    D = jnp.eye(m, dtype=jnp.float32) + jnp.diag(-jnp.ones(m - 1, jnp.float32), k=1)
    # precision='highest' so the two-term difference D @ a is exact and matches
    # the kernel's exact shift-and-subtract.
    b = jnp.einsum('ij,bj->bi', D, a, precision='highest')
    sa = jnp.clip(a[:, None, :] - phi_a[None, :, None], 0.0, 1.0)
    sb = jnp.clip(b[:, None, :] - phi_b[None, :, None], 0.0, 1.0)
    g = jnp.einsum('bnm,bkm->bnk', sa, sb)
    out = g.reshape(B, -1) @ weight + bias
    return jnp.maximum(out, 0.0)


if __name__ == "__main__":
    # Small, module-consistent shapes: C=1 (gray), M=16 -> in_dim=256,
    # num_pixel_vals N=16, hidden=32.  B=16 auto-tiles to two TB=8 batch blocks
    # so the parallel grid has two steps (one per v7x TensorCore).
    B, C, M = 16, 1, 16
    N = 16
    HID = 32

    key = jax.random.PRNGKey(0)
    k1, k2, k3, k4, k5 = jax.random.split(key, 5)
    x = jax.random.uniform(k1, (B, C, M, M), jnp.float32, 0.0, float(N))
    # Deterministic in-script parameter init matching the module's __init__ shapes:
    phi_a = jax.random.uniform(k2, (N,), jnp.float32, 0.0, float(N))       # uniform(0, N)
    phi_b = jax.random.uniform(k3, (N,), jnp.float32, 0.0, float(N))       # uniform(0, N)
    weight = jax.random.normal(k4, (N * N, HID), jnp.float32)              # normal()
    bias = jax.random.normal(k5, (HID,), jnp.float32)                      # normal()

    out = glcm_forward(x, phi_a, phi_b, weight, bias)
    out = jax.block_until_ready(out)
    assert out.shape == (B, HID)

    ref = glcm_reference(x, phi_a, phi_b, weight, bias)
    np.testing.assert_allclose(np.asarray(out), np.asarray(ref), rtol=5e-4, atol=5e-4)

    print("KERNEL_OK")
</pallas_src>

<mosaic_0001>
module attributes {stable_mosaic.version = 11 : i64} {
  func.func @glcm_kernel(%arg0: i32, %arg1: memref<8x256xf32, #tpu.memory_space<vmem>>, %arg2: memref<2x16x1xf32, #tpu.memory_space<vmem>>, %arg3: memref<1x256xf32, #tpu.memory_space<vmem>>, %arg4: memref<256x128xf32, #tpu.memory_space<vmem>>, %arg5: memref<1x128xf32, #tpu.memory_space<vmem>>, %arg6: memref<8x128xf32, #tpu.memory_space<vmem>>) attributes {dimension_semantics = [#tpu.dimension_semantics<parallel>], iteration_bounds = array<i64: 2>, scalar_prefetch = 0 : i64, scratch_operands = 0 : i64, tpu.core_type = #tpu.core_type<tc>, window_params = [{transform_indices = @transform_0, window_bounds = array<i64: 8, 256>}, {pipeline_mode = #tpu.pipeline_mode<synchronous>, transform_indices = @transform_1, window_bounds = array<i64: 2, 16, 1>}, {pipeline_mode = #tpu.pipeline_mode<synchronous>, transform_indices = @transform_2, window_bounds = array<i64: 1, 256>}, {pipeline_mode = #tpu.pipeline_mode<synchronous>, transform_indices = @transform_3, window_bounds = array<i64: 256, 128>}, {pipeline_mode = #tpu.pipeline_mode<synchronous>, transform_indices = @transform_4, window_bounds = array<i64: 1, 128>}, {transform_indices = @transform_5, window_bounds = array<i64: 8, 128>}]} {
    %c0 = arith.constant 0 : index
    %c0_0 = arith.constant 0 : index
    %0 = vector.load %arg1[%c0, %c0_0] : memref<8x256xf32, #tpu.memory_space<vmem>>, vector<8x256xf32>
    %c255_i32 = arith.constant 255 : i32
    %1 = tpu.dynamic_rotate %0 by %c255_i32 dim 1 : vector<8x256xf32>, i32 -> vector<8x256xf32>
    %c0_1 = arith.constant 0 : index
    %c0_2 = arith.constant 0 : index
    %2 = vector.load %arg3[%c0_1, %c0_2] : memref<1x256xf32, #tpu.memory_space<vmem>>, vector<1x256xf32>
    %3 = vector.broadcast %2 : vector<1x256xf32> to vector<8x256xf32>
    %4 = arith.mulf %1, %3 : vector<8x256xf32>
    %5 = arith.subf %0, %4 : vector<8x256xf32>
    %c0_3 = arith.constant 0 : index
    %c0_4 = arith.constant 0 : index
    %c0_5 = arith.constant 0 : index
    %6 = vector.load %arg2[%c0_3, %c0_4, %c0_5] : memref<2x16x1xf32, #tpu.memory_space<vmem>>, vector<2x16x1xf32>
    %7 = vector.shape_cast %0 : vector<8x256xf32> to vector<8x1x256xf32>
    %8 = vector.extract_strided_slice %6 {offsets = [0, 0, 0], sizes = [1, 16, 1], strides = [1, 1, 1]} : vector<2x16x1xf32> to vector<1x16x1xf32>
    %9 = vector.shape_cast %8 : vector<1x16x1xf32> to vector<16x1xf32>
    %10 = vector.shape_cast %9 : vector<16x1xf32> to vector<1x16x1xf32>
    %11 = vector.broadcast %7 : vector<8x1x256xf32> to vector<8x16x256xf32>
    %12 = vector.broadcast %10 : vector<1x16x1xf32> to vector<8x16x256xf32>
    %13 = arith.subf %11, %12 : vector<8x16x256xf32>
    %cst = arith.constant 0.000000e+00 : f32
    %cst_6 = arith.constant 1.000000e+00 : f32
    %14 = vector.broadcast %cst : f32 to vector<8x16x256xf32>
    %15 = arith.maximumf %14, %13 : vector<8x16x256xf32>
    %16 = vector.broadcast %cst_6 : f32 to vector<8x16x256xf32>
    %17 = arith.minimumf %16, %15 : vector<8x16x256xf32>
    %18 = vector.shape_cast %5 : vector<8x256xf32> to vector<8x1x256xf32>
    %19 = vector.extract_strided_slice %6 {offsets = [1, 0, 0], sizes = [1, 16, 1], strides = [1, 1, 1]} : vector<2x16x1xf32> to vector<1x16x1xf32>
    %20 = vector.shape_cast %19 : vector<1x16x1xf32> to vector<16x1xf32>
    %21 = vector.shape_cast %20 : vector<16x1xf32> to vector<1x16x1xf32>
    %22 = vector.broadcast %18 : vector<8x1x256xf32> to vector<8x16x256xf32>
    %23 = vector.broadcast %21 : vector<1x16x1xf32> to vector<8x16x256xf32>
    %24 = arith.subf %22, %23 : vector<8x16x256xf32>
    %cst_7 = arith.constant 0.000000e+00 : f32
    %cst_8 = arith.constant 1.000000e+00 : f32
    %25 = vector.broadcast %cst_7 : f32 to vector<8x16x256xf32>
    %26 = arith.maximumf %25, %24 : vector<8x16x256xf32>
    %27 = vector.broadcast %cst_8 : f32 to vector<8x16x256xf32>
    %28 = arith.minimumf %27, %26 : vector<8x16x256xf32>
    %cst_9 = arith.constant dense<0.000000e+00> : vector<8x16x16xf32>
    %29 = tpu.matmul %17, %28, %cst_9 {dimension_numbers = #tpu.dot_dimension_numbers<[2], [2], [1], [1], [0, 0, 0, 1, 1, 1], [0], [0]>} : vector<8x16x256xf32>, vector<8x16x256xf32>, vector<8x16x16xf32> -> vector<8x16x16xf32>
    %30 = vector.shape_cast %29 : vector<8x16x16xf32> to vector<8x256xf32>
    %c0_10 = arith.constant 0 : index
    %c0_11 = arith.constant 0 : index
    %31 = vector.load %arg4[%c0_10, %c0_11] : memref<256x128xf32, #tpu.memory_space<vmem>>, vector<256x128xf32>
    %cst_12 = arith.constant dense<0.000000e+00> : vector<8x128xf32>
    %32 = tpu.matmul %30, %31, %cst_12 {dimension_numbers = #tpu.dot_dimension_numbers<[1], [0], [0], [1], [0, 0, 1, 1], [], []>} : vector<8x256xf32>, vector<256x128xf32>, vector<8x128xf32> -> vector<8x128xf32>
    %c0_13 = arith.constant 0 : index
    %c0_14 = arith.constant 0 : index
    %33 = vector.load %arg5[%c0_13, %c0_14] : memref<1x128xf32, #tpu.memory_space<vmem>>, vector<1x128xf32>
    %34 = vector.broadcast %33 : vector<1x128xf32> to vector<8x128xf32>
    %35 = arith.addf %32, %34 : vector<8x128xf32>
    %cst_15 = arith.constant 0.000000e+00 : f32
    %36 = vector.broadcast %cst_15 : f32 to vector<8x128xf32>
    %37 = arith.maximumf %35, %36 : vector<8x128xf32>
    %c0_16 = arith.constant 0 : index
    %c0_17 = arith.constant 0 : index
    %38 = vector.load %arg6[%c0_16, %c0_17] : memref<8x128xf32, #tpu.memory_space<vmem>>, vector<8x128xf32>
    tpu.vector_store %arg6[%c0_16, %c0_17], %37 {strides = array<i32>} : memref<8x128xf32, #tpu.memory_space<vmem>>, vector<8x128xf32>,
    return
  }
  func.func @transform_0(%arg0: i32) -> (i32, i32) {
    %c0_i32 = arith.constant 0 : i32
    %c0_i32_0 = arith.constant 0 : i32
    return %arg0, %c0_i32 : i32, i32
  }
  func.func @transform_1(%arg0: i32) -> (i32, i32, i32) {
    %c0_i32 = arith.constant 0 : i32
    %c0_i32_0 = arith.constant 0 : i32
    %c0_i32_1 = arith.constant 0 : i32
    %c0_i32_2 = arith.constant 0 : i32
    return %c0_i32, %c0_i32_0, %c0_i32_1 : i32, i32, i32
  }
  func.func @transform_2(%arg0: i32) -> (i32, i32) {
    %c0_i32 = arith.constant 0 : i32
    %c0_i32_0 = arith.constant 0 : i32
    %c0_i32_1 = arith.constant 0 : i32
    return %c0_i32, %c0_i32_0 : i32, i32
  }
  func.func @transform_3(%arg0: i32) -> (i32, i32) {
    %c0_i32 = arith.constant 0 : i32
    %c0_i32_0 = arith.constant 0 : i32
    %c0_i32_1 = arith.constant 0 : i32
    return %c0_i32, %c0_i32_0 : i32, i32
  }
  func.func @transform_4(%arg0: i32) -> (i32, i32) {
    %c0_i32 = arith.constant 0 : i32
    %c0_i32_0 = arith.constant 0 : i32
    %c0_i32_1 = arith.constant 0 : i32
    return %c0_i32, %c0_i32_0 : i32, i32
  }
  func.func @transform_5(%arg0: i32) -> (i32, i32) {
    %c0_i32 = arith.constant 0 : i32
    %c0_i32_0 = arith.constant 0 : i32
    return %arg0, %c0_i32 : i32, i32
  }
}

</mosaic_0001>

<bundles_post_ra>
// kernel: tpu_custom_call.1
= control target key start
LH: loop header
LB: loop body
LE: loop exit
PB: predicated region body
PF: predicated region fallthrough
CT: control target
= control target key end

     0   :  { %10 = vsyncpa [#allocation3], 0  ;;  %s2704_s0 = inlined_call_operand.vmem [shape: f32[16,256], index: 0, kind: input, shape index: {}]   ;;  %s2705_s1 = inlined_call_operand.vmem [shape: f32[2,16,1], index: 1, kind: input, shape index: {}]   ;;  %s2706_s2 = inlined_call_operand.vmem [shape: f32[1,256], index: 2, kind: input, shape index: {}]   ;;  %s2707_s3 = inlined_call_operand.hbm [shape: f32[256,128], index: 3, kind: input, shape index: {}]   ;;  %s2708_s4 = inlined_call_operand.vmem [shape: f32[1,128], index: 4, kind: input, shape index: {}]   ;;  %s2709_s5 = inlined_call_operand.hbm [shape: f32[16,128], index: 5, kind: output, shape index: {}]  }
   0x1   :  { %11 = vsyncpa [#allocation4], 0 }
   0x2   :  { %13 = vsyncpa [#allocation4 + $0x1], 0  ;;  %s2249_s18 = smov 0   ;;  %s2251_s19 = smov 0  }
   0x3   :  { %s2253_s20 = smov 0   ;;  %s2255_s21 = smov 0  }
   0x4 LB: > { %s2270_s22 = sadd.s32 4294967295, %s2201_s21   ;;  %s1890_s23 = sadd.s32 4294967294, %s2201_s21   ;;  %s2201_s21 = sphi %s2255_s21, %s2725_s21   ;;  %s2197_s20 = sphi %s2253_s20, %s2724_s20   ;;  %s2193_s19 = sphi %s2251_s19, %s2723_s19   ;;  %s2189_s18 = sphi %s2249_s18, %s2722_s18  }
   0x5   : > { %s2274_s24 = sadd.s32 1, %s2201_s21   ;;  %s136_s25 = sadd.s32 1, %s2197_s20 }
   0x6   : > { %s133_s26 = ssub.s32 %s2201_s21, %s2274_s24  ;;  %p146_p0 = scmp.ne.s32.totalorder %s2197_s20, %s2193_s19 }
   0x7   : > { %p134_p1 = scmp.eq.s32.totalorder %s133_s26, 0  ;;  %p147_p2 = scmp.eq.s32.totalorder %s2270_s22, 1 }
   0x8   : > { %p152_p3 = scmp.ne.s32.totalorder %s2193_s19, %s2189_s18  ;;  %p153_p4 = scmp.eq.s32.totalorder %s1890_s23, 1 }
   0x9   : > { %s2285_s27 = scalar_select %p134_p1, %s2197_s20, %s136_s25  }
   0xa   : > { %p2287_p5 = por %p147_p2, %p146_p0  ;;  %p2291_p6 = por %p153_p4, %p152_p3 }
   0xb   : > { %p1891_p7 = scmp.ge.s32.totalorder %s2201_s21, 1  ;;  %p160_p8 = scmp.lt.s32.totalorder %s2201_s21, 3 }
   0xc   : > { %s2713_s28 = scalar_select %p2287_p5, 1, 0 }
   0xd   : > { %s2714_s29 = scalar_select %p2291_p6, 1, 0 }
   0xe   : > { %p2710_p9 = scmp.eq.s32.totalorder %s2270_s22, 0  ;;  %p2298_p10 = pnand %p1891_p7, %p160_p8 }
   0xf   : > { %s2203_s6 = smov [#allocation2]   ;;  %s2107_s11 = scalar_lea.hbm %s2707_s3, 4096 }
  0x10   : > { %s2715_s30 = scalar_select %p2298_p10, 1, 0 }
  0x11   : > { %s178_s7 = sshll.u32 %s2203_s6, 4  ;;  %p2010_p11 = pneg %p2298_p10  ;;  %s179_s7 = int_to_ptr.vmem [resolvable:$true] %s178_s7 }
  0x12   : > { %p2108_p13 = scmp.ne.s32.totalorder %s2707_s3, %s2107_s11  ;;  %p2114_p3 = scmp.lt.u32.totalorder %s2107_s11, %s2707_s3 }
  0x13   : > { %p2306_p12 = pnand %p2710_p9, %p2010_p11 }
  0x15   : > { %p2109_p0 = pneg %p2306_p12 }
  0x17   : > { %p2110_p1 = pnand %p2109_p0, %p2108_p13 }
  0x19   : > { %p2111_p2 = pneg %p2110_p1 }
  0x1b   : > { %p2116_p4 = pnand %p2114_p3, %p2111_p2 }
  0x1d   : > { %2119 = shalt.err (!%p2116_p4)
}
  0x1e   : > { %s2120_s16 = scalar_lea.vmem %s179_s7, 4096  ;;  %p2128_p9 = scmp.lt.s32.totalorder %s179_s7, %s179_s7 }
  0x1f   : > { %p2121_p7 = scmp.ne.s32.totalorder %s179_s7, %s2120_s16  ;;  %p2129_p6 = scmp.lt.s32.totalorder %s2120_s16, %s2120_s16 }
  0x21   : > { %p2123_p8 = pnand %p2121_p7, %p2109_p0  ;;  %p2130_p5 = por %p2129_p6, %p2128_p9 }
  0x23   : > { %p2124_p11 = pneg %p2123_p8 }
  0x25   : > { %p2131_p10 = pnand %p2130_p5, %p2124_p11 }
  0x27   : > { %2134 = shalt.err (!%p2131_p10)
}
  0x28   : > { %s2204_s17 = smov 128   ;;  %s2205_s23 = smov 8  }
  0x29   : > { %2013 = dma.hbm_to_vmem [thread:$0]  (!%p2306_p12), %s2707_s3, 4096, %s179_s7, [#allocation3], %s2204_s17, %s2204_s17, %s2205_s23  }
  0x2a   : > { %p2717_p13 = scmp.ne.s32.totalorder %s2715_s30, 0 }
  0x2b   : > { %p2718_p1 = scmp.eq.s32.totalorder (!%p2717_p13), %s2270_s22, 0 }
  0x2c   : > { %205 = sbr.rel (%p2717_p13) target bundleno = 851 (0x353), region = 40 }
  0x33   : > { %2180 = dma.done.wait (%p2718_p1), [#allocation3], 4096   ;;  %p2719_p0 = pmov %p2718_p1 }
  0x34   : > { %p233_p5 = scmp.lt.s32.totalorder %s2270_s22, 1  ;;  %v2206_v0 = vmov 0   ;;  %v267_v1 = vld [vmem:[%s2705_s1 + $0x10] sm:$0xff]  ;;  %s2207_s12 = smov 127   ;;  %v268_v3 = vld [vmem:[%s2705_s1 + $0x18] sm:$0xff]  ;;  %v266_v5 = vld [vmem:[%s2705_s1 + $0x8] sm:$0xff]  ;;  %v244_v9 = vlaneseq }
  0x35   : > { %2182 = vsyncadd (%p2719_p0), [#allocation3], 4294963200  ;;  %2068 = vset.pattern.permute.xlu1 %v2206_v0  ;;  %2069 = vset.pattern.permute.xlu0 %v2206_v0  ;;  %v265_v6 = vld [vmem:[%s2705_s1] sm:$0xff]  ;;  %v2208_v7 = vmov 1966171168   ;;  %s2213_s9 = smov 64  }
  0x36   : > { %s234_s6 = scalar_select %p233_p5, %s2270_s22, 1  ;;  %641 = vperm.xlu1 %2068, %v267_v1   ;;  %v274_v8 = vunpack.c.l.s4 %v2208_v7  ;;  %v2349_v11 = vshrl.u32 %v244_v9, 7  ;;  %v245_v14 = vand.u32 127, %v244_v9  ;;  %v249_v18 = vld [vmem:[%s2706_s2] sm:$0x3]  ;;  %vm1673_vm1 = vcmask 130048  }
  0x37   : > { %s2214_s10 = smov 48   ;;  %s2216_s30 = smov 80   ;;  %vm1675_vm2 = vcmask 261120   ;;  %vm1677_vm3 = vcmask 392192   ;;  %vm1679_vm4 = vcmask 523264   ;;  %vm1681_vm5 = vcmask 654336  }
  0x38   : > { %s1904_s8 = sshll.u32 %s234_s6, 4  ;;  %v275_v10 = vunpack.c.0.s8 %v274_v8  ;;  %v2355_v15 = vsub.s32 0, %v2349_v11  ;;  %v2358_v16 = vsub.s32 1, %v2349_v11  ;;  %vm246_vm0 = vcmp.lt.s32.totalorder %v245_v14, 127  ;;  %s2211_s6 = smov 32  }
  0x39   : > { %s237_s7 = scalar_lea.vmem %s2704_s0, %s1904_s8  ;;  %s2212_s8 = smov 16   ;;  %vm1683_vm6 = vcmask 785408   ;;  %vm1685_vm7 = vcmask 916480  }
  0x3a   : > { %v238_v2 = vld [vmem:[%s237_s7] sm:$0xff]  ;;  %v239_v4 = vld [vmem:[%s237_s7 + $0x8] sm:$0xff]  ;;  %646 = vperm.xlu1 %2068, %v268_v3   ;;  %v2352_v13 = vsub.s32 %v275_v10, %v2349_v11  ;;  %v254_v21 = vrot.slane %v249_v18, %v2355_v15  ;;  %v258_v22 = vrot.slane %v249_v18, %v2358_v16  ;;  %s2215_s7 = smov 96   ;;  %s2217_s11 = smov 112  }
  0x3b   : > { %240 = vrot.lane.b32.xlu0 %v238_v2, %s2207_s12  ;;  %v271_v12 = vcombine.low %v238_v2, %v239_v4  ;;  %v272_v17 = vcombine.high %v238_v2, %v239_v4  ;;  %s1901_s16 = sshll.u32 %s2270_s22, 7  ;;  %p2720_p9 = scmp.ne.s32.totalorder %s2713_s28, 0 }
  0x3c   : > { %s2218_s22 = smov [#allocation5]  }
  0x3d   : > { %v279_v19 = vrot.slane %v271_v12, %v2352_v13  ;;  %v2367_v24 = vrot.slane %v272_v17, %v2352_v13 }
  0x3e   : > { %408 = vperm.xlu1 %2068, %v266_v5  }
  0x3f   : > { %242 = vrot.lane.b32.xlu0 %v239_v4, %s2207_s12  ;;  %v287_v23 = vcombine.high %v279_v19, %v279_v19  ;;  %v302_v28 = vrot.slane %v2367_v24, %v2352_v13  ;;  %v295_v31 = vrot.slane %v279_v19, %v2352_v13  ;;  %v288_v38 = vcombine.high %v2367_v24, %v2367_v24  ;;  %s230_s12 = sand.u32 1, %s2193_s19  }
  0x40   : > { %s1896_s13 = sshll.u32 %s230_s12, 3 }
  0x41   : > { %v309_v32 = vrot.slane %v287_v23, %v2352_v13  ;;  %v318_v35 = vcombine.high %v302_v28, %v302_v28  ;;  %v2376_v39 = vrot.slane %v295_v31, %v2358_v16  ;;  %v2379_v40 = vrot.slane %v302_v28, %v2358_v16  ;;  %s232_s17 = scalar_lea.vmem [#allocation5], %s1896_s13 }
  0x42   : > { %v317_v41 = vcombine.high %v295_v31, %v295_v31  ;;  %v2384_v45 = vrot.slane %v295_v31, %v2355_v15  ;;  %v2387_v46 = vrot.slane %v302_v28, %v2355_v15  ;;  %s1819_s23 = sshll.u32 %s232_s17, 4  ;;  %s2664_s23 = int_to_ptr.vmem [resolvable:$true] %s1819_s23 }
  0x43   : > { %403 = vperm.xlu0 %2069, %v265_v6   ;;  %v319_v42 = vcombine.high %v309_v32, %v309_v32  ;;  %v2392_v48 = vrot.slane %v309_v32, %v2358_v16  ;;  %v2395_v49 = vrot.slane %v318_v35, %v2355_v15  ;;  %v2398_v50 = vrot.slane %v318_v35, %v2358_v16 }
  0x44   : > { %v2401_v51 = vrot.slane %v309_v32, %v2355_v15  ;;  %v2406_v56 = vrot.slane %v317_v41, %v2355_v15  ;;  %v2409_v57 = vrot.slane %v317_v41, %v2358_v16 }
  0x45   : > { %v2412_v58 = vrot.slane %v319_v42, %v2355_v15  ;;  %v2415_v59 = vrot.slane %v319_v42, %v2358_v16 }
  0xad   : > { %v241_v20 = vpop.permute.xlu0 %240 }
  0xb1   : > { %v243_v25 = vpop.permute.xlu0 %242 }
  0xb2   : > { %v247_v26 = vsel %vm246_vm0, %v241_v20, %v243_v25  ;;  %v248_v27 = vsel %vm246_vm0, %v243_v25, %v241_v20 }
  0xb3   : > { %v261_v29 = vmul.f32 %v254_v21, %v247_v26  ;;  %v262_v30 = vmul.f32 %v258_v22, %v248_v27 }
  0xb5   : > { %v263_v33 = vsub.f32 %v238_v2, %v261_v29  ;;  %v264_v34 = vsub.f32 %v239_v4, %v262_v30  ;;  %v2389_v47 = vpop.permute.xlu1 %641 }
  0xb7   : > { %v509_v36 = vcombine.low %v263_v33, %v264_v34  ;;  %v510_v37 = vcombine.high %v263_v33, %v264_v34 }
  0xb9   : > { %v517_v43 = vrot.slane %v509_v36, %v2352_v13  ;;  %v524_v44 = vrot.slane %v510_v37, %v2352_v13  ;;  %v2425_v0 = vpop.permute.xlu1 %646 }
  0xbb   : > { %v525_v52 = vcombine.high %v517_v43, %v517_v43  ;;  %v526_v53 = vcombine.high %v524_v44, %v524_v44  ;;  %v533_v54 = vrot.slane %v517_v43, %v2352_v13  ;;  %v540_v55 = vrot.slane %v524_v44, %v2352_v13 }
  0xbd   : > { %v2418_v60 = vrot.slane %v525_v52, %v2352_v13  ;;  %v2421_v61 = vrot.slane %v526_v53, %v2352_v13  ;;  %v566_v62 = vrot.slane %v533_v54, %v2358_v16  ;;  %v598_v63 = vrot.slane %v540_v55, %v2358_v16 }
  0xbe   : > { %v562_v1 = vrot.slane %v533_v54, %v2355_v15  ;;  %v594_v2 = vrot.slane %v540_v55, %v2355_v15  ;;  %v2429_v3 = vcombine.high %v540_v55, %v540_v55  ;;  %v2431_v4 = vcombine.high %v533_v54, %v533_v54 }
  0xbf   : > { %v650_v5 = vsub.f32 %v566_v62, %v2389_v47  ;;  %v652_v6 = vsub.f32 %v566_v62, %v2425_v0  ;;  %v666_v7 = vsub.f32 %v598_v63, %v2389_v47  ;;  %v668_v8 = vsub.f32 %v598_v63, %v2425_v0 }
  0xc0   : > { %v649_v9 = vsub.f32 %v562_v1, %v2389_v47  ;;  %v651_v10 = vsub.f32 %v562_v1, %v2425_v0  ;;  %v665_v12 = vsub.f32 %v594_v2, %v2389_v47  ;;  %v667_v14 = vsub.f32 %v594_v2, %v2425_v0 }
  0xc1   : > { %v682_v17 = vmax.f32 %v650_v5, 0.0  ;;  %v684_v18 = vmax.f32 %v652_v6, 0.0  ;;  %v698_v19 = vmax.f32 %v666_v7, 0.0  ;;  %v700_v20 = vmax.f32 %v668_v8, 0.0  ;;  %v2457_v5 = vpop.permute.xlu1 %408 }
  0xc2   : > { %v681_v21 = vmax.f32 %v649_v9, 0.0  ;;  %v683_v22 = vmax.f32 %v651_v10, 0.0  ;;  %v697_v23 = vmax.f32 %v665_v12, 0.0  ;;  %v699_v25 = vmax.f32 %v667_v14, 0.0  ;;  %v2441_v30 = vpop.permute.xlu0 %403 }
  0xc3   : > { %v714_v26 = vmin.f32 %v682_v17, 1.0  ;;  %v716_v27 = vmin.f32 %v684_v18, 1.0  ;;  %v730_v28 = vmin.f32 %v698_v19, 1.0  ;;  %v732_v29 = vmin.f32 %v700_v20, 1.0 }
  0xc4   : > { %v713_v31 = vmin.f32 %v681_v21, 1.0  ;;  %v715_v32 = vmin.f32 %v683_v22, 1.0  ;;  %v729_v33 = vmin.f32 %v697_v23, 1.0  ;;  %v731_v34 = vmin.f32 %v699_v25, 1.0 }
  0xc5   : > { %v1940_v35 = vpack.c.bf16 %v716_v27, %v714_v26  ;;  %v1956_v36 = vpack.c.bf16 %v732_v29, %v730_v28  ;;  %v574_v37 = vrot.slane %v2418_v60, %v2358_v16  ;;  %v614_v41 = vrot.slane %v2429_v3, %v2358_v16 }
  0xc6   : > { %v1942_v42 = vpack.c.bf16 %v715_v32, %v713_v31  ;;  %v1958_v43 = vpack.c.bf16 %v731_v34, %v729_v33  ;;  %v412_v44 = vsub.f32 %v2376_v39, %v2441_v30  ;;  %v428_v52 = vsub.f32 %v2379_v40, %v2441_v30 }
  0xc7   : > { %1941 = vmatprep.subr.bf16.mxu1 %v1940_v35  ;;  %1957 = vmatprep.subr.bf16.mxu0 %v1956_v36  ;;  %v654_v53 = vsub.f32 %v574_v37, %v2389_v47  ;;  %v656_v54 = vsub.f32 %v574_v37, %v2425_v0  ;;  %v674_v55 = vsub.f32 %v614_v41, %v2389_v47 }
  0xc8   : > { %1943 = vmatpush1.bf16.xpose.msra.mxu1 %v1942_v42  ;;  %1959 = vmatpush1.bf16.xpose.msra.mxu0 %v1958_v43  ;;  %v676_v62 = vsub.f32 %v614_v41, %v2425_v0  ;;  %v444_v63 = vmax.f32 %v412_v44, 0.0  ;;  %v460_v1 = vmax.f32 %v428_v52, 0.0  ;;  %v411_v2 = vsub.f32 %v2384_v45, %v2441_v30 }
  0xc9   : > { %v686_v6 = vmax.f32 %v654_v53, 0.0  ;;  %v688_v7 = vmax.f32 %v656_v54, 0.0  ;;  %v706_v8 = vmax.f32 %v674_v55, 0.0  ;;  %v427_v9 = vsub.f32 %v2387_v46, %v2441_v30 }
  0xca   : > { %v708_v10 = vmax.f32 %v676_v62, 0.0  ;;  %v476_v12 = vmin.f32 %v444_v63, 1.0  ;;  %v492_v14 = vmin.f32 %v460_v1, 1.0  ;;  %v443_v17 = vmax.f32 %v411_v2, 0.0 }
  0xcb   : > { %v718_v18 = vmin.f32 %v686_v6, 1.0  ;;  %v720_v19 = vmin.f32 %v688_v7, 1.0  ;;  %v738_v20 = vmin.f32 %v706_v8, 1.0  ;;  %v459_v21 = vmax.f32 %v427_v9, 0.0 }
  0xcc   : > { %v740_v22 = vmin.f32 %v708_v10, 1.0  ;;  %809 = vmatprep.mubr.f32.mxu1 %v476_v12  ;;  %1109 = vmatprep.mubr.f32.mxu0 %v492_v14  ;;  %v475_v23 = vmin.f32 %v443_v17, 1.0  ;;  %v414_v25 = vsub.f32 %v2376_v39, %v2457_v5  ;;  %v570_v26 = vrot.slane %v2418_v60, %v2355_v15 }
  0xcd   : > { %v1944_v27 = vpack.c.bf16 %v720_v19, %v718_v18  ;;  %v491_v28 = vmin.f32 %v459_v21, 1.0  ;;  %v430_v29 = vsub.f32 %v2379_v40, %v2457_v5  ;;  %v610_v31 = vrot.slane %v2429_v3, %v2355_v15 }
  0xce   : > { %v1964_v32 = vpack.c.bf16 %v740_v22, %v738_v20  ;;  %v446_v33 = vmax.f32 %v414_v25, 0.0  ;;  %v653_v34 = vsub.f32 %v570_v26, %v2389_v47  ;;  %v655_v35 = vsub.f32 %v570_v26, %v2425_v0 }
  0xcf   : > { %1945 = vmatprep.subr.bf16.mxu1 %v1944_v27  ;;  %810 = vmatmul.mubr.f32.vlgmr.msra.gmra.mrb[0].mxu1 %v475_v23  ;;  %v462_v39 = vmax.f32 %v430_v29, 0.0  ;;  %v673_v36 = vsub.f32 %v610_v31, %v2389_v47  ;;  %v675_v37 = vsub.f32 %v610_v31, %v2425_v0  ;;  %v582_v41 = vrot.slane %v2431_v4, %v2358_v16 }
  0xd0   : > { %1965 = vmatprep.subr.bf16.mxu0 %v1964_v32  ;;  %1110 = vmatmul.mubr.f32.vlgmr.msra.gmra.mrb[0].mxu0 %v491_v28  ;;  %v478_v40 = vmin.f32 %v446_v33, 1.0  ;;  %v685_v3 = vmax.f32 %v653_v34, 0.0  ;;  %v687_v42 = vmax.f32 %v655_v35, 0.0  ;;  %v413_v43 = vsub.f32 %v2384_v45, %v2457_v5 }
  0xd1   : > { %v494_v44 = vmin.f32 %v462_v39, 1.0  ;;  %v705_v52 = vmax.f32 %v673_v36, 0.0  ;;  %v707_v53 = vmax.f32 %v675_v37, 0.0  ;;  %v658_v54 = vsub.f32 %v582_v41, %v2389_v47 }
  0xd2   : > { %814 = vmatprep.mubr.f32.mxu1 %v478_v40  ;;  %v717_v55 = vmin.f32 %v685_v3, 1.0  ;;  %v719_v62 = vmin.f32 %v687_v42, 1.0  ;;  %v660_v63 = vsub.f32 %v582_v41, %v2425_v0  ;;  %v445_v1 = vmax.f32 %v413_v43, 0.0 }
  0xd3   : > { %1114 = vmatprep.mubr.f32.mxu0 %v494_v44  ;;  %v737_v2 = vmin.f32 %v705_v52, 1.0  ;;  %v739_v6 = vmin.f32 %v707_v53, 1.0  ;;  %v690_v7 = vmax.f32 %v658_v54, 0.0  ;;  %v429_v8 = vsub.f32 %v2387_v46, %v2457_v5 }
  0xd4   : > { %v1946_v9 = vpack.c.bf16 %v719_v62, %v717_v55  ;;  %v692_v45 = vmax.f32 %v660_v63, 0.0  ;;  %v477_v10 = vmin.f32 %v445_v1, 1.0  ;;  %v416_v12 = vsub.f32 %v2392_v48, %v2441_v30 }
  0xd5   : > { %v1966_v14 = vpack.c.bf16 %v739_v6, %v737_v2  ;;  %v722_v17 = vmin.f32 %v690_v7, 1.0  ;;  %v461_v18 = vmax.f32 %v429_v8, 0.0  ;;  %v436_v19 = vsub.f32 %v2398_v50, %v2441_v30 }
  0xd6   : > { %1947 = vmatpush1.bf16.xpose.msra.mxu1 %v1946_v9  ;;  %v724_v20 = vmin.f32 %v692_v45, 1.0  ;;  %v448_v21 = vmax.f32 %v416_v12, 0.0  ;;  %v415_v22 = vsub.f32 %v2401_v51, %v2441_v30  ;;  %v435_v46 = vsub.f32 %v2395_v49, %v2441_v30 }
  0xd7   : > { %1967 = vmatpush1.bf16.xpose.msra.mxu0 %v1966_v14  ;;  %815 = vmatmul.mubr.f32.gmra.mrb[2].mxu1 %v477_v10  ;;  %v493_v23 = vmin.f32 %v461_v18, 1.0  ;;  %v468_v25 = vmax.f32 %v436_v19, 0.0  ;;  %v418_v26 = vsub.f32 %v2392_v48, %v2457_v5  ;;  %v578_v27 = vrot.slane %v2431_v4, %v2355_v15 }
  0xd8   : > { %v1948_v28 = vpack.c.bf16 %v724_v20, %v722_v17  ;;  %v480_v29 = vmin.f32 %v448_v21, 1.0  ;;  %v447_v31 = vmax.f32 %v415_v22, 0.0  ;;  %v467_v32 = vmax.f32 %v435_v46, 0.0 }
  0xd9   : > { %1115 = vmatmul.mubr.f32.gmra.mrb[2].mxu0 %v493_v23  ;;  %v500_v33 = vmin.f32 %v468_v25, 1.0  ;;  %v450_v34 = vmax.f32 %v418_v26, 0.0  ;;  %v657_v35 = vsub.f32 %v578_v27, %v2389_v47  ;;  %v659_v39 = vsub.f32 %v578_v27, %v2425_v0 }
  0xda   : > { %1949 = vmatprep.subr.bf16.mxu1 %v1948_v28  ;;  %884 = vmatprep.mubr.f32.mxu1 %v480_v29  ;;  %v479_v36 = vmin.f32 %v447_v31, 1.0  ;;  %v499_v37 = vmin.f32 %v467_v32, 1.0  ;;  %v438_v48 = vsub.f32 %v2398_v50, %v2457_v5  ;;  %v557_v4 = vcombine.high %v2418_v60, %v2418_v60 }
  0xdb   : > { %1259 = vmatprep.mubr.f32.mxu0 %v500_v33  ;;  %v482_v41 = vmin.f32 %v450_v34, 1.0  ;;  %v689_v40 = vmax.f32 %v657_v35, 0.0  ;;  %v691_v3 = vmax.f32 %v659_v39, 0.0  ;;  %v417_v42 = vsub.f32 %v2401_v51, %v2457_v5 }
  0xdc   : > { %v470_v43 = vmax.f32 %v438_v48, 0.0  ;;  %v590_v44 = vrot.slane %v557_v4, %v2358_v16  ;;  %v437_v52 = vsub.f32 %v2395_v49, %v2457_v5  ;;  %v420_v53 = vsub.f32 %v2409_v57, %v2441_v30 }
  0xdd   : > { %885 = vmatmul.mubr.f32.vlgmr.msra.gmra.mrb[4].mxu1 %v479_v36  ;;  %v721_v50 = vmin.f32 %v689_v40, 1.0  ;;  %v723_v54 = vmin.f32 %v691_v3, 1.0  ;;  %v449_v60 = vmax.f32 %v417_v42, 0.0  ;;  %v419_v55 = vsub.f32 %v2406_v56, %v2441_v30 }
  0xde   : > { %1260 = vmatmul.mubr.f32.vlgmr.msra.gmra.mrb[4].mxu0 %v499_v37  ;;  %889 = vmatprep.mubr.f32.mxu1 %v482_v41  ;;  %v502_v62 = vmin.f32 %v470_v43, 1.0  ;;  %v662_v51 = vsub.f32 %v590_v44, %v2389_v47  ;;  %v664_v63 = vsub.f32 %v590_v44, %v2425_v0  ;;  %v469_v1 = vmax.f32 %v437_v52, 0.0 }
  0xdf   : > { %v1950_v2 = vpack.c.bf16 %v723_v54, %v721_v50  ;;  %v481_v49 = vmin.f32 %v449_v60, 1.0  ;;  %v452_v6 = vmax.f32 %v420_v53, 0.0  ;;  %v451_v7 = vmax.f32 %v419_v55, 0.0 }
  0xe0   : > { %1264 = vmatprep.mubr.f32.mxu0 %v502_v62  ;;  %v694_v8 = vmax.f32 %v662_v51, 0.0  ;;  %v696_v9 = vmax.f32 %v664_v63, 0.0  ;;  %v501_v45 = vmin.f32 %v469_v1, 1.0  ;;  %v422_v10 = vsub.f32 %v2409_v57, %v2457_v5 }
  0xe1   : > { %1951 = vmatpush1.bf16.xpose.msra.mxu1 %v1950_v2  ;;  %v484_v12 = vmin.f32 %v452_v6, 1.0  ;;  %v586_v14 = vrot.slane %v557_v4, %v2355_v15  ;;  %v606_v17 = vrot.slane %v2421_v61, %v2358_v16  ;;  %v316_v18 = vrot.slane %v288_v38, %v2352_v13 }
  0xe2   : > { %v726_v19 = vmin.f32 %v694_v8, 1.0  ;;  %v728_v20 = vmin.f32 %v696_v9, 1.0  ;;  %890 = vmatmul.mubr.f32.gmra.mrb[6].mxu1 %v481_v49  ;;  %1265 = vmatmul.mubr.f32.gmra.mrb[6].mxu0 %v501_v45  ;;  %v454_v21 = vmax.f32 %v422_v10, 0.0  ;;  %v421_v57 = vsub.f32 %v2406_v56, %v2457_v5 }
  0xe3   : > { %959 = vmatprep.mubr.f32.mxu1 %v484_v12  ;;  %v661_v22 = vsub.f32 %v586_v14, %v2389_v47  ;;  %v663_v46 = vsub.f32 %v586_v14, %v2425_v0  ;;  %v670_v23 = vsub.f32 %v606_v17, %v2389_v47  ;;  %v672_v25 = vsub.f32 %v606_v17, %v2425_v0 }
  0xe4   : > { %v1952_v26 = vpack.c.bf16 %v728_v20, %v726_v19  ;;  %v483_v24 = vmin.f32 %v451_v7, 1.0  ;;  %v453_v13 = vmax.f32 %v421_v57, 0.0  ;;  %v424_v38 = vsub.f32 %v2415_v59, %v2441_v30 }
  0xe5   : > { %v693_v27 = vmax.f32 %v661_v22, 0.0  ;;  %v695_v28 = vmax.f32 %v663_v46, 0.0  ;;  %v702_v29 = vmax.f32 %v670_v23, 0.0  ;;  %v704_v31 = vmax.f32 %v672_v25, 0.0 }
  0xe6   : > { %1953 = vmatprep.subr.bf16.mxu1 %v1952_v26  ;;  %v486_v56 = vmin.f32 %v454_v21, 1.0  ;;  %v456_v32 = vmax.f32 %v424_v38, 0.0  ;;  %v423_v33 = vsub.f32 %v2412_v58, %v2441_v30  ;;  %v426_v34 = vsub.f32 %v2415_v59, %v2457_v5 }
  0xe7   : > { %v725_v35 = vmin.f32 %v693_v27, 1.0  ;;  %v727_v39 = vmin.f32 %v695_v28, 1.0  ;;  %v734_v36 = vmin.f32 %v702_v29, 1.0  ;;  %v736_v37 = vmin.f32 %v704_v31, 1.0 }
  0xe8   : > { %960 = vmatmul.mubr.f32.vlgmr.msra.gmra.mrb[8].mxu1 %v483_v24  ;;  %v602_v48 = vrot.slane %v2421_v61, %v2355_v15  ;;  %v368_v4 = vrot.slane %v316_v18, %v2358_v16  ;;  %v485_v40 = vmin.f32 %v453_v13, 1.0  ;;  %v455_v3 = vmax.f32 %v423_v33, 0.0 }
  0xe9   : > { %964 = vmatprep.mubr.f32.mxu1 %v486_v56  ;;  %v1954_v41 = vpack.c.bf16 %v727_v39, %v725_v35  ;;  %v558_v42 = vcombine.high %v2421_v61, %v2421_v61  ;;  %v1960_v43 = vpack.c.bf16 %v736_v37, %v734_v36  ;;  %v458_v44 = vmax.f32 %v426_v34, 0.0 }
  0xea   : > { %v669_v59 = vsub.f32 %v602_v48, %v2389_v47  ;;  %v671_v52 = vsub.f32 %v602_v48, %v2425_v0  ;;  %v488_v53 = vmin.f32 %v456_v32, 1.0  ;;  %v425_v54 = vsub.f32 %v2412_v58, %v2457_v5 }
  0xeb   : > { %1955 = vmatpush1.bf16.xpose.msra.mxu1 %v1954_v41  ;;  %v622_v50 = vrot.slane %v558_v42, %v2358_v16  ;;  %v432_v62 = vsub.f32 %v368_v4, %v2441_v30  ;;  %v618_v61 = vrot.slane %v558_v42, %v2355_v15  ;;  %v364_v1 = vrot.slane %v316_v18, %v2355_v15  ;;  %v1694_v42 = vld [vmem:[#allocation2] sm:$0xff] }
  0xec   : > { %1961 = vmatprep.subr.bf16.mxu1 %v1960_v43  ;;  %965 = vmatmul.mubr.f32.gmra.mrb[10].mxu1 %v485_v40  ;;  %v701_v60 = vmax.f32 %v669_v59, 0.0  ;;  %v703_v55 = vmax.f32 %v671_v52, 0.0  ;;  %v320_v2 = vcombine.high %v316_v18, %v316_v18  ;;  %v487_v49 = vmin.f32 %v455_v3, 1.0  ;;  %v1710_v40 = vld [vmem:[#allocation2 + $0x80] sm:$0xff]  ;;  %v1711_v3 = vld [vmem:[#allocation2 + $0x88] sm:$0xff]  ;;  %v1712_v59 = vld [vmem:[#allocation2 + $0x90] sm:$0xff] }
  0xed   : > { %1034 = vmatprep.mubr.f32.mxu1 %v488_v53  ;;  %v678_v51 = vsub.f32 %v622_v50, %v2389_v47  ;;  %v680_v63 = vsub.f32 %v622_v50, %v2425_v0  ;;  %v490_v6 = vmin.f32 %v458_v44, 1.0  ;;  %v457_v45 = vmax.f32 %v425_v54, 0.0  ;;  %v1695_v44 = vld [vmem:[#allocation2 + $0x8] sm:$0xff]  ;;  %v1713_v52 = vld [vmem:[#allocation2 + $0x98] sm:$0xff]  ;;  %v1696_v50 = vld [vmem:[#allocation2 + $0x10] sm:$0xff] }
  0xee   : > { %v733_v7 = vmin.f32 %v701_v60, 1.0  ;;  %v735_v58 = vmin.f32 %v703_v55, 1.0  ;;  %v677_v10 = vsub.f32 %v618_v61, %v2389_v47  ;;  %v464_v12 = vmax.f32 %v432_v62, 0.0  ;;  %v1697_v54 = vld [vmem:[#allocation2 + $0x18] sm:$0xff]  ;;  %v1714_v60 = vld [vmem:[#allocation2 + $0xa0] sm:$0xff]  ;;  %v1715_v55 = vld [vmem:[#allocation2 + $0xa8] sm:$0xff] }
  0xef   : > { %v710_v8 = vmax.f32 %v678_v51, 0.0  ;;  %v712_v9 = vmax.f32 %v680_v63, 0.0  ;;  %v431_v14 = vsub.f32 %v364_v1, %v2441_v30  ;;  %v434_v17 = vsub.f32 %v368_v4, %v2457_v5  ;;  %v1698_v51 = vld [vmem:[#allocation2 + $0x20] sm:$0xff]  ;;  %v1699_v63 = vld [vmem:[#allocation2 + $0x28] sm:$0xff] }
  0xf0   : > { %v679_v19 = vsub.f32 %v618_v61, %v2425_v0  ;;  %v1962_v20 = vpack.c.bf16 %v735_v58, %v733_v7  ;;  %v709_v18 = vmax.f32 %v677_v10, 0.0  ;;  %v384_v23 = vrot.slane %v320_v2, %v2358_v16  ;;  %v1700_v7 = vld [vmem:[#allocation2 + $0x30] sm:$0xff]  ;;  %v1701_v58 = vld [vmem:[#allocation2 + $0x38] sm:$0xff] }
  0xf1   : > { %v742_v21 = vmin.f32 %v710_v8, 1.0  ;;  %v744_v57 = vmin.f32 %v712_v9, 1.0  ;;  %v489_v25 = vmin.f32 %v457_v45, 1.0  ;;  %v463_v47 = vmax.f32 %v431_v14, 0.0 }
  0xf2   : > { %1035 = vmatmul.mubr.f32.vlgmr.msra.gmra.mrb[12].mxu1 %v487_v49  ;;  %v711_v22 = vmax.f32 %v679_v19, 0.0  ;;  %v466_v26 = vmax.f32 %v434_v17, 0.0  ;;  %v433_v24 = vsub.f32 %v364_v1, %v2457_v5  ;;  %v496_v13 = vmin.f32 %v464_v12, 1.0  ;;  %v1716_v1 = vld [vmem:[#allocation2 + $0xb0] sm:$0xff] }
  0xf3   : > { %1039 = vmatprep.mubr.f32.mxu1 %v490_v6  ;;  %1963 = vmatpush1.bf16.xpose.msra.mxu1 %v1962_v20  ;;  %v1968_v46 = vpack.c.bf16 %v744_v57, %v742_v21  ;;  %v741_v38 = vmin.f32 %v709_v18, 1.0  ;;  %v440_v27 = vsub.f32 %v384_v23, %v2441_v30  ;;  %v380_v28 = vrot.slane %v320_v2, %v2355_v15  ;;  %v1717_v2 = vld [vmem:[#allocation2 + $0xb8] sm:$0xff] }
  0xf4   : > { %v743_v0 = vmin.f32 %v711_v22, 1.0  ;;  %v495_v29 = vmin.f32 %v463_v47, 1.0  ;;  %v465_v31 = vmax.f32 %v433_v24, 0.0  ;;  %v498_v16 = vmin.f32 %v466_v26, 1.0 }
  0xf5   : > { %1969 = vmatprep.subr.bf16.mxu1 %v1968_v46  ;;  %v439_v56 = vsub.f32 %v380_v28, %v2441_v30  ;;  %v472_v33 = vmax.f32 %v440_v27, 0.0  ;;  %v442_v34 = vsub.f32 %v384_v23, %v2457_v5  ;;  %v441_v36 = vsub.f32 %v380_v28, %v2457_v5 }
  0xf6   : > { %1040 = vmatmul.mubr.f32.gmra.mrb[14].mxu1 %v489_v25  ;;  %v1970_v32 = vpack.c.bf16 %v743_v0, %v741_v38  ;;  %v497_v35 = vmin.f32 %v465_v31, 1.0  ;;  %v1972_v43 = vpack.c.bf16 %v1711_v3, %v1710_v40  ;;  %v1974_v53 = vpack.c.bf16 %v1695_v44, %v1694_v42 }
  0xf7   : > { %1184 = vmatprep.mubr.f32.mxu1 %v496_v13  ;;  %v471_v39 = vmax.f32 %v439_v56, 0.0  ;;  %v504_v37 = vmin.f32 %v472_v33, 1.0  ;;  %v474_v48 = vmax.f32 %v442_v34, 0.0  ;;  %v473_v4 = vmax.f32 %v441_v36, 0.0 }
  0xf8   : > { %v1976_v5 = vpack.c.bf16 %v1713_v52, %v1712_v59  ;;  %1973 = vmatprep.subr.bf16.mxu0 %v1972_v43  ;;  %v1978_v62 = vpack.c.bf16 %v1697_v54, %v1696_v50  ;;  %v1980_v61 = vpack.c.bf16 %v1715_v55, %v1714_v60  ;;  %v1982_v49 = vpack.c.bf16 %v1699_v63, %v1698_v51 }
  0xf9   : > { %v503_v15 = vmin.f32 %v471_v39, 1.0  ;;  %v506_v41 = vmin.f32 %v474_v48, 1.0  ;;  %v505_v30 = vmin.f32 %v473_v4, 1.0  ;;  %1975 = vmatpush3.bf16.msra.mxu0 %v1974_v53  ;;  %v1984_v6 = vpack.c.bf16 %v1717_v2, %v1716_v1 }
  0xfa   : > { %1185 = vmatmul.mubr.f32.vlgmr.msra.gmra.mrb[16].mxu1 %v495_v29  ;;  %1977 = vmatprep.subr.bf16.mxu0 %v1976_v5  ;;  %v1986_v8 = vpack.c.bf16 %v1701_v58, %v1700_v7  ;;  %v2209_v14 = vmov 1983009808  }
  0xfb   : > { %1189 = vmatprep.mubr.f32.mxu1 %v498_v16  ;;  %1971 = vmatpush1.bf16.xpose.msra.mxu1 %v1970_v32  ;;  %v1348_v17 = vunpack.c.l.s4 %v2209_v14 }
  0xfd   : > { %1979 = vmatpush3.bf16.msra.mxu0 %v1978_v62  ;;  %v1349_v21 = vunpack.c.0.s8 %v1348_v17 }
  0xfe   : > { %1190 = vmatmul.mubr.f32.gmra.mrb[18].mxu1 %v497_v35  ;;  %1981 = vmatprep.subr.bf16.mxu0 %v1980_v61 }
  0xff   : > { %1334 = vmatprep.mubr.f32.mxu1 %v504_v37  ;;  %v2558_v22 = vsub.s32 %v1349_v21, %v2349_v11 }
 0x101   : > { %1983 = vmatpush3.bf16.msra.mxu0 %v1982_v49 }
 0x102   : > { %1335 = vmatmul.mubr.f32.vlgmr.msra.gmra.mrb[20].mxu1 %v503_v15  ;;  %1985 = vmatprep.subr.bf16.mxu0 %v1984_v6  ;;  %v2210_v15 = vmov 1934713408  }
 0x103   : > { %1339 = vmatprep.mubr.f32.mxu1 %v506_v41  ;;  %v1412_v4 = vunpack.c.l.s4 %v2210_v15  ;;  %v1718_v15 = vld [vmem:[#allocation2 + $0xc0] sm:$0xff] }
 0x105   : > { %1987 = vmatpush3.bf16.msra.mxu0 %v1986_v8  ;;  %v1413_v43 = vunpack.c.0.s8 %v1412_v4  ;;  %v1719_v4 = vld [vmem:[#allocation2 + $0xc8] sm:$0xff] }
 0x106   : > { %1340 = vmatmul.mubr.f32.gmra.mrb[22].mxu1 %v505_v30 }
 0x107   : > { %v2577_v5 = vsub.s32 %v1413_v43, %v2349_v11 }
 0x1a2   : > { %v811_v9 = vpop.f32.mrb[0].mxu1 }
 0x1a3   : > { %v1111_v45 = vpop.f32.mrb[0].mxu0  ;;  %v813_v10 = vpop.f32.mrb[1].mxu1 }
 0x1a4   : > { %v1113_v12 = vpop.f32.mrb[1].mxu0 }
 0x1aa   : > { %v816_v19 = vpop.f32.mrb[2].mxu1 }
 0x1ab   : > { %v818_v20 = vpop.f32.mrb[3].mxu1 }
 0x1ac   : > { %v1116_v57 = vpop.f32.mrb[2].mxu0 }
 0x1ad   : > { %v1118_v18 = vpop.f32.mrb[3].mxu0 }
 0x1b0   : > { %v886_v46 = vpop.f32.mrb[4].mxu1 }
 0x1b1   : > { %v1261_v23 = vpop.f32.mrb[4].mxu0  ;;  %v888_v25 = vpop.f32.mrb[5].mxu1 }
 0x1b2   : > { %v1377_v47 = vcombine.low %v1111_v45, %v1261_v23  ;;  %v1378_v26 = vcombine.high %v1111_v45, %v1261_v23  ;;  %v1263_v24 = vpop.f32.mrb[5].mxu0 }
 0x1b4   : > { %v2561_v13 = vrot.slane %v1377_v47, %v2558_v22  ;;  %v2564_v38 = vrot.slane %v1378_v26, %v2558_v22 }
 0x1b5   : > { %v891_v0 = vpop.f32.mrb[6].mxu1  ;;  %v1266_v27 = vpop.f32.mrb[6].mxu0 }
 0x1b6   : > { %v1513_v28 = vcombine.low %v1116_v57, %v1266_v27  ;;  %v1514_v29 = vcombine.high %v1116_v57, %v1266_v27  ;;  %v893_v31 = vpop.f32.mrb[7].mxu1  ;;  %v1268_v56 = vpop.f32.mrb[7].mxu0 }
 0x1b8   : > { %v2567_v16 = vrot.slane %v1513_v28, %v2558_v22  ;;  %v2570_v32 = vrot.slane %v1514_v29, %v2558_v22 }
 0x1bb   : > { %v961_v33 = vpop.f32.mrb[8].mxu1 }
 0x1bc   : > { %v1345_v34 = vcombine.low %v811_v9, %v961_v33  ;;  %v1346_v35 = vcombine.high %v811_v9, %v961_v33  ;;  %v963_v39 = vpop.f32.mrb[9].mxu1 }
 0x1be   : > { %v1353_v36 = vrot.slane %v1345_v34, %v2558_v22  ;;  %v1360_v37 = vrot.slane %v1346_v35, %v2558_v22 }
 0x1bf   : > { %v966_v48 = vpop.f32.mrb[10].mxu1 }
 0x1c0   : > { %v1481_v41 = vcombine.low %v816_v19, %v966_v48  ;;  %v1482_v30 = vcombine.high %v816_v19, %v966_v48  ;;  %v968_v40 = vpop.f32.mrb[11].mxu1 }
 0x1c2   : > { %v1489_v3 = vrot.slane %v1481_v41, %v2558_v22  ;;  %v1496_v42 = vrot.slane %v1482_v30, %v2558_v22  ;;  %v1988_v30 = vpack.c.bf16 %v1719_v4, %v1718_v15 }
 0x1c4   : > { %1989 = vmatprep.subr.bf16.mxu0 %v1988_v30 }
 0x1c5   : > { %v1036_v44 = vpop.f32.mrb[12].mxu1 }
 0x1c6   : > { %v1361_v59 = vcombine.low %v886_v46, %v1036_v44  ;;  %v1362_v52 = vcombine.high %v886_v46, %v1036_v44  ;;  %v1038_v53 = vpop.f32.mrb[13].mxu1 }
 0x1c7   : > { %v1703_v53 = vld [vmem:[#allocation2 + $0x48] sm:$0xff] }
 0x1c8   : > { %v1369_v50 = vrot.slane %v1361_v59, %v2558_v22  ;;  %v1376_v54 = vrot.slane %v1362_v52, %v2558_v22 }
 0x1c9   : > { %v1041_v60 = vpop.f32.mrb[14].mxu1 }
 0x1ca   : > { %v1409_v55 = vcombine.low %v1353_v36, %v1369_v50  ;;  %v1410_v62 = vcombine.high %v1353_v36, %v1369_v50  ;;  %v1425_v61 = vcombine.low %v1360_v37, %v1376_v54  ;;  %v1426_v51 = vcombine.high %v1360_v37, %v1376_v54  ;;  %v1043_v63 = vpop.f32.mrb[15].mxu1 }
 0x1cb   : > { %v1497_v1 = vcombine.low %v891_v0, %v1041_v60  ;;  %v1498_v2 = vcombine.high %v891_v0, %v1041_v60 }
 0x1cc   : > { %v2582_v49 = vrot.slane %v1409_v55, %v2577_v5  ;;  %v2585_v6 = vrot.slane %v1410_v62, %v2577_v5  ;;  %v2588_v11 = vrot.slane %v1425_v61, %v2577_v5  ;;  %v2591_v7 = vrot.slane %v1426_v51, %v2577_v5  ;;  %v1720_v62 = vld [vmem:[#allocation2 + $0xd0] sm:$0xff]  ;;  %v1721_v61 = vld [vmem:[#allocation2 + $0xd8] sm:$0xff] }
 0x1cd   : > { %v1505_v58 = vrot.slane %v1497_v1, %v2558_v22  ;;  %v1512_v8 = vrot.slane %v1498_v2, %v2558_v22  ;;  %v1186_v9 = vpop.f32.mrb[16].mxu1  ;;  %v1992_v2 = vpack.c.bf16 %v1721_v61, %v1720_v62 }
 0x1ce   : > { %v1188_v45 = vpop.f32.mrb[17].mxu1 }
 0x1cf   : > { %v1545_v10 = vcombine.low %v1489_v3, %v1505_v58  ;;  %v1546_v12 = vcombine.high %v1489_v3, %v1505_v58  ;;  %v1561_v14 = vcombine.low %v1496_v42, %v1512_v8  ;;  %v1562_v17 = vcombine.high %v1496_v42, %v1512_v8  ;;  %v1705_v58 = vld [vmem:[#allocation2 + $0x58] sm:$0xff] }
 0x1d1   : > { %v2596_v19 = vrot.slane %v1545_v10, %v2577_v5  ;;  %v2599_v20 = vrot.slane %v1546_v12, %v2577_v5  ;;  %v2602_v21 = vrot.slane %v1561_v14, %v2577_v5  ;;  %v2605_v57 = vrot.slane %v1562_v17, %v2577_v5  ;;  %v1191_v18 = vpop.f32.mrb[18].mxu1  ;;  %v1722_v14 = vld [vmem:[#allocation2 + $0xe0] sm:$0xff]  ;;  %v1723_v17 = vld [vmem:[#allocation2 + $0xe8] sm:$0xff] }
 0x1d2   : > { %v1193_v46 = vpop.f32.mrb[19].mxu1 }
 0x1d5   : > { %v1336_v23 = vpop.f32.mrb[20].mxu1 }
 0x1d6   : > { %v1393_v25 = vcombine.low %v1186_v9, %v1336_v23  ;;  %v1394_v47 = vcombine.high %v1186_v9, %v1336_v23  ;;  %v1338_v26 = vpop.f32.mrb[21].mxu1 }
 0x1d8   : > { %v1401_v24 = vrot.slane %v1393_v25, %v2558_v22  ;;  %v1408_v0 = vrot.slane %v1394_v47, %v2558_v22  ;;  %v1706_v47 = vld [vmem:[#allocation2 + $0x60] sm:$0xff] }
 0x1d9   : > { %v1341_v27 = vpop.f32.mrb[22].mxu1 }
 0x1da   : > { %v1441_v28 = vcombine.low %v2561_v13, %v1401_v24  ;;  %v1442_v29 = vcombine.high %v2561_v13, %v1401_v24  ;;  %v1457_v31 = vcombine.low %v2564_v38, %v1408_v0  ;;  %v1458_v56 = vcombine.high %v2564_v38, %v1408_v0  ;;  %v1343_v33 = vpop.f32.mrb[23].mxu1 }
 0x1db   : > { %v1529_v34 = vcombine.low %v1191_v18, %v1341_v27  ;;  %v1530_v35 = vcombine.high %v1191_v18, %v1341_v27  ;;  %v1724_v27 = vld [vmem:[#allocation2 + $0xf0] sm:$0xff] }
 0x1dc   : > { %v2614_v39 = vrot.slane %v1441_v28, %v2577_v5  ;;  %v1456_v36 = vrot.slane %v1442_v29, %v2577_v5  ;;  %v1465_v37 = vrot.slane %v1457_v31, %v2577_v5  ;;  %v1472_v48 = vrot.slane %v1458_v56, %v2577_v5  ;;  %v1725_v28 = vld [vmem:[#allocation2 + $0xf8] sm:$0xff]  ;;  %v1708_v31 = vld [vmem:[#allocation2 + $0x70] sm:$0xff] }
 0x1dd   : > { %v1537_v13 = vrot.slane %v1529_v34, %v2558_v22  ;;  %v1544_v41 = vrot.slane %v1530_v35, %v2558_v22  ;;  %v1702_v22 = vld [vmem:[#allocation2 + $0x40] sm:$0xff]  ;;  %v2000_v29 = vpack.c.bf16 %v1725_v28, %v1724_v27  ;;  %v1709_v56 = vld [vmem:[#allocation2 + $0x78] sm:$0xff] }
 0x1de   : > { %v1473_v38 = vcombine.low %v2582_v49, %v2614_v39  ;;  %v1475_v40 = vcombine.low %v2585_v6, %v1456_v36  ;;  %v1474_v3 = vcombine.high %v2582_v49, %v2614_v39  ;;  %v1477_v42 = vcombine.low %v2588_v11, %v1465_v37 }
 0x1df   : > { %v1577_v43 = vcombine.low %v2567_v16, %v1537_v13  ;;  %v1578_v44 = vcombine.high %v2567_v16, %v1537_v13  ;;  %v1593_v59 = vcombine.low %v2570_v32, %v1544_v41  ;;  %v1594_v52 = vcombine.high %v2570_v32, %v1544_v41 }
 0x1e0   : > { %v1476_v50 = vcombine.high %v2585_v6, %v1456_v36  ;;  %v1479_v54 = vcombine.low %v2591_v7, %v1472_v48  ;;  %v1478_v60 = vcombine.high %v2588_v11, %v1465_v37  ;;  %v1480_v55 = vcombine.high %v2591_v7, %v1472_v48  ;;  %v1704_v6 = vld [vmem:[#allocation2 + $0x50] sm:$0xff] }
 0x1e1   : > { %v2636_v51 = vrot.slane %v1577_v43, %v2577_v5  ;;  %v1592_v16 = vrot.slane %v1578_v44, %v2577_v5  ;;  %v1601_v32 = vrot.slane %v1593_v59, %v2577_v5  ;;  %v1608_v63 = vrot.slane %v1594_v52, %v2577_v5 }
 0x1e2   : > { %v1990_v1 = vpack.c.bf16 %v1703_v53, %v1702_v22  ;;  %v1994_v25 = vpack.c.bf16 %v1705_v58, %v1704_v6  ;;  %v2002_v33 = vpack.c.bf16 %v1709_v56, %v1708_v31 }
 0x1e3   : > { %v1609_v11 = vcombine.low %v2596_v19, %v2636_v51  ;;  %v1611_v7 = vcombine.low %v2599_v20, %v1592_v16  ;;  %v1610_v8 = vcombine.high %v2596_v19, %v2636_v51  ;;  %v1613_v9 = vcombine.low %v2602_v21, %v1601_v32  ;;  %v1707_v19 = vld [vmem:[#allocation2 + $0x68] sm:$0xff] }
 0x1e4   : > { %v1612_v45 = vcombine.high %v2599_v20, %v1592_v16  ;;  %v1615_v10 = vcombine.low %v2605_v57, %v1608_v63  ;;  %v1614_v5 = vcombine.high %v2602_v21, %v1601_v32  ;;  %v1616_v12 = vcombine.high %v2605_v57, %v1608_v63  ;;  %1991 = vmatpush3.bf16.msra.mxu0 %v1990_v1 }
 0x1e5   : > { %v2075_v18 = vpack.i.bf16 %v1475_v40, %v1611_v7  ;;  %v2070_v46 = vpack.i.bf16 %v1474_v3, %v1610_v8  ;;  %v2085_v23 = vpack.i.bf16 %v1477_v42, %v1613_v9  ;;  %1993 = vmatprep.subr.bf16.mxu0 %v1992_v2  ;;  %v1996_v21 = vpack.c.bf16 %v1723_v17, %v1722_v14 }
 0x1e6   : > { %v2080_v26 = vpack.i.bf16 %v1476_v50, %v1612_v45  ;;  %v2095_v24 = vpack.i.bf16 %v1479_v54, %v1615_v10  ;;  %v2090_v0 = vpack.i.bf16 %v1478_v60, %v1614_v5  ;;  %v2100_v20 = vpack.i.bf16 %v1480_v55, %v1616_v12 }
 0x1e7   : > { %2076 = vrot.lane.b32.xlu0 %v2075_v18, %s2211_s6  ;;  %2071 = vrot.lane.b32.xlu1 %v2070_v46, %s2212_s8  ;;  %v1998_v57 = vpack.c.bf16 %v1707_v19, %v1706_v47  ;;  %s2662_s6 = scalar_lea.hbm %s2709_s5, %s1901_s16  ;;  %s1806_s8 = scalar_lea.sflag [#allocation4], %s230_s12 }
 0x1e8   : > { %1995 = vmatpush3.bf16.msra.mxu0 %v1994_v25 }
 0x1e9   : > { %1997 = vmatprep.subr.bf16.mxu0 %v1996_v21 }
 0x1eb   : > { %2086 = vrot.lane.b32.xlu0 %v2085_v23, %s2213_s9  ;;  %2081 = vrot.lane.b32.xlu1 %v2080_v26, %s2214_s10  ;;  %s2135_s9 = scalar_lea.vmem %s2664_s23, 128  ;;  %s2139_s10 = sshll.u32 %s2218_s22, 4  ;;  %s2140_s10 = int_to_ptr.vmem [resolvable:$false] %s2139_s10 }
 0x1ec   : > { %1999 = vmatpush3.bf16.msra.mxu0 %v1998_v57  ;;  %p2136_p6 = scmp.ne.s32.totalorder %s2664_s23, %s2135_s9  ;;  %p2142_p2 = scmp.lt.s32.totalorder %s2664_s23, %s2140_s10 }
 0x1ed   : > { %2001 = vmatprep.subr.bf16.mxu0 %v2000_v29 }
 0x1ee   : > { %p2137_p10 = pnand %p2136_p6, %p2720_p9 }
 0x1ef   : > { %2096 = vrot.lane.b32.xlu0 %v2095_v24, %s2215_s7  ;;  %2091 = vrot.lane.b32.xlu1 %v2090_v0, %s2216_s30  ;;  %s2141_s7 = scalar_lea.vmem %s2140_s10, 256 }
 0x1f0   : > { %2003 = vmatpush3.bf16.msra.mxu0 %v2002_v33  ;;  %p2138_p12 = pneg %p2137_p10  ;;  %p2143_p3 = scmp.lt.s32.totalorder %s2141_s7, %s2135_s9 }
 0x1f2   : > { %p2144_p4 = por %p2143_p3, %p2142_p2 }
 0x1f3   : > { %2101 = vrot.lane.b32.xlu1 %v2100_v20, %s2217_s11 }
 0x1f4   : > { %p2145_p7 = pnand %p2144_p4, %p2138_p12 }
 0x259   : > { %v2077_v34 = vpop.permute.xlu0 %2076  ;;  %v2072_v35 = vpop.permute.xlu1 %2071 }
 0x25a   : > { %v2074_v36 = vunpack.i.h.bf16 %v2072_v35  ;;  %v2073_v37 = vunpack.i.l.bf16 %v2072_v35  ;;  %v2079_v48 = vunpack.i.h.bf16 %v2077_v34  ;;  %v2078_v15 = vunpack.i.l.bf16 %v2077_v34 }
 0x25c   : > { %v1674_v4 = vsel %vm1673_vm1, %v1473_v38, %v2074_v36  ;;  %v1687_v13 = vsel %vm1673_vm1, %v1609_v11, %v2073_v37  ;;  %v1899_v11 = vld [vmem:[%s2708_s4] ss:$0 sm:$0xff] }
 0x25d   : > { %v2087_v41 = vpop.permute.xlu0 %2086  ;;  %v2082_v30 = vpop.permute.xlu1 %2081  ;;  %v1676_v44 = vsel %vm1675_vm2, %v1674_v4, %v2079_v48  ;;  %v1688_v59 = vsel %vm1675_vm2, %v1687_v13, %v2078_v15 }
 0x25e   : > { %v2084_v40 = vunpack.i.h.bf16 %v2082_v30  ;;  %v2083_v3 = vunpack.i.l.bf16 %v2082_v30  ;;  %v2089_v42 = vunpack.i.h.bf16 %v2087_v41  ;;  %v2088_v43 = vunpack.i.l.bf16 %v2087_v41 }
 0x260   : > { %v1678_v52 = vsel %vm1677_vm3, %v1676_v44, %v2084_v40  ;;  %v1689_v22 = vsel %vm1677_vm3, %v1688_v59, %v2083_v3 }
 0x261   : > { %v2097_v53 = vpop.permute.xlu0 %2096  ;;  %v2092_v50 = vpop.permute.xlu1 %2091  ;;  %v1680_v60 = vsel %vm1679_vm4, %v1678_v52, %v2089_v42  ;;  %v1690_v55 = vsel %vm1679_vm4, %v1689_v22, %v2088_v43 }
 0x262   : > { %v2094_v54 = vunpack.i.h.bf16 %v2092_v50  ;;  %v2093_v49 = vunpack.i.l.bf16 %v2092_v50  ;;  %v2099_v39 = vunpack.i.h.bf16 %v2097_v53  ;;  %v2098_v38 = vunpack.i.l.bf16 %v2097_v53 }
 0x264   : > { %v1682_v62 = vsel %vm1681_vm5, %v1680_v60, %v2094_v54  ;;  %v1691_v61 = vsel %vm1681_vm5, %v1690_v55, %v2093_v49 }
 0x265   : > { %v2102_v51 = vpop.permute.xlu1 %2101  ;;  %v1692_v63 = vsel %vm1683_vm6, %v1691_v61, %v2098_v38  ;;  %v1684_v1 = vsel %vm1683_vm6, %v1682_v62, %v2099_v39 }
 0x266   : > { %v2104_v16 = vunpack.i.h.bf16 %v2102_v51  ;;  %v2103_v32 = vunpack.i.l.bf16 %v2102_v51 }
 0x268   : > { %v1693_v2 = vsel %vm1685_vm7, %v1692_v63, %v2103_v32  ;;  %v1686_v6 = vsel %vm1685_vm7, %v1684_v1, %v2104_v16 }
 0x269   : > { %1797 = vmatprep.mubr.f32.mxu0 %v1693_v2 }
 0x26a   : > { %1798 = vmatmul.mubr.f32.vlgmr.msra.gmra.mrb[8].mxu0 %v1686_v6 }
 0x33d   : > { %v1937_v58 = vpop.f32.mrb[8].mxu0 }
 0x33e   : > { %v1938_v7 = vpop.f32.mrb[9].mxu0 }
 0x33f   : > { %v1939_v8 = vadd.f32 %v1938_v7, %v1937_v58 }
 0x341   : > { %v1800_v9 = vadd.f32 %v1939_v8, %v1899_v11 }
 0x343   : > { %v1803_v45 = vmax.f32 %v1800_v9, 0.0 }
 0x345   : > { %1804 = vst [vmem:[%s232_s17] sm:$0xff] %v1803_v45 }
 0x346   : > { %2148 = shalt.err (!%p2145_p7)
}
 0x347   : > { %s2149_s30 = scalar_lea.hbm %s2662_s6, 128  ;;  %s2153_s13 = scalar_lea.hbm %s2709_s5, 256 }
 0x348   : > { %p2150_p8 = scmp.ne.s32.totalorder %s2662_s6, %s2149_s30  ;;  %p2154_p1 = scmp.lt.u32.totalorder %s2662_s6, %s2709_s5 }
 0x349   : > { %p2155_p0 = scmp.lt.u32.totalorder %s2153_s13, %s2149_s30  ;;  %p2157_p6 = scmp.lt.u32.totalorder %s2149_s30, %s2662_s6 }
 0x34a   : > { %p2151_p11 = pnand %p2150_p8, %p2720_p9 }
 0x34b   : > { %p2156_p5 = por %p2155_p0, %p2154_p1 }
 0x34c   : > { %p2152_p13 = pneg %p2151_p11 }
 0x34d   : > { %p2158_p10 = por %p2157_p6, %p2156_p5 }
 0x34f   : > { %p2159_p12 = pnand %p2158_p10, %p2152_p13 }
 0x351   : > { %2162 = shalt.err (!%p2159_p12)
}
 0x352   : > { %2008 = dma.vmem_to_hbm [thread:$0]  (%p2720_p9), %s2664_s23, 128, %s2662_s6, %s1806_s8  }
 0x353 PF: > { %p2020_p2 = scmp.ge.s32.totalorder %s2201_s21, 2  ;;  %s1831_s16 = sand.u32 1, %s2189_s18  }
 0x354   : > { %p2721_p3 = scmp.ne.s32.totalorder %s2714_s29, 0  ;;  %s1832_s17 = scalar_lea.sflag [#allocation4], %s1831_s16 }
 0x356   : > { %p2015_p4 = pnand %p2020_p2, %p2721_p3 }
 0x358   : > { %2184 = dma.done.wait (!%p2015_p4), %s1832_s17, 128  }
 0x359   : > { %2186 = vsyncadd (!%p2015_p4), %s1832_s17, 4294967168  ;;  %p16_p7 = scmp.ge.s32.totalorder %s2274_s24, 4   ;;  %s2722_s18 = smov %s2193_s19 }
 0x35a   : > { %s2723_s19 = smov %s2197_s20  ;;  %s2724_s20 = smov %s2285_s27 }
 0x35b   : > { %s2725_s21 = smov %s2274_s24  ;;  %18 = sbr.rel (!%p16_p7) target bundleno = 4 (0x4), region = 80 }
 0x362   :  { %1837 = vsyncpa [#allocation3], 1 }
 0x363   :  { %1839 = vsyncpa [#allocation3 + $0x1], 1 }
 0x364   :  { %1840 = vsyncpa [#allocation4], 1 }
 0x365   :  { %1842 = vsyncpa [#allocation4 + $0x1], 1 }

</bundles_post_ra>
